<compile_context>
chip_gen: v7x
topology: tpu7x:2x2x1
jax: 0.10.0
libtpu: 0.0.40
codegen_flags: <defaults>
</compile_context>

<pallas_src>
import functools

import jax
import jax.numpy as jnp
from jax.experimental import pallas as pl
from jax.experimental.pallas import tpu as pltpu


LANE = 128        # lane width: pad all feature dims to a multiple of this
SUBLANE = 8       # sublane width: batch tiles must be a multiple of this
_RESIDENT_BUDGET_BYTES = 44 << 20   # conservative "all weights resident" budget
                                    # (fits v7x's 64 MiB VMEM with headroom)


def _round_up(n: int, m: int) -> int:
    return ((n + m - 1) // m) * m


# --------------------------------------------------------------------------
# Parameter init / one-time padding
# --------------------------------------------------------------------------
def init_dnn_params(key, input_features, num_classes, hidden_layers, hidden_nodes):
    """Deterministic init mimicking nn.Linear's uniform(-1/sqrt(fan_in))."""
    dims = [input_features] + [hidden_nodes] * hidden_layers + [num_classes]
    params = []
    for din, dout in zip(dims[:-1], dims[1:]):
        key, kw, kb = jax.random.split(key, 3)
        bound = 1.0 / jnp.sqrt(jnp.float32(din))
        w = jax.random.uniform(kw, (din, dout), jnp.float32, -bound, bound)
        b = jax.random.uniform(kb, (1, dout), jnp.float32, -bound, bound)
        params.append((w, b))
    return params


def prepare_dnn_params(params, *, input_features, compute_dtype=jnp.float32):
    """Pad every feature dim up to a multiple of LANE ONCE (outside the
    per-call forward) and cast weights to the MXU compute dtype (f32 or bf16).
    Biases stay f32: they are added on the f32 accumulator inside the kernel.
    Returns (padded_params, meta)."""
    din_p = _round_up(input_features, LANE)
    padded = []
    prev_p = din_p
    for (w, b) in params:
        d_in, d_out = w.shape
        d_out_p = _round_up(d_out, LANE)
        w_p = jnp.zeros((prev_p, d_out_p), jnp.float32).at[:d_in, :d_out].set(w)
        b_p = jnp.zeros((1, d_out_p), jnp.float32).at[:, :d_out].set(b)
        padded.append((w_p.astype(compute_dtype), b_p))
        prev_p = d_out_p
    meta = dict(
        input_features=input_features,
        num_classes=params[-1][0].shape[1],
        din_p=din_p,
        dout_p=prev_p,
        compute_dtype=compute_dtype,
    )
    return padded, meta


# --------------------------------------------------------------------------
# Fused whole-MLP kernel (all weights resident in VMEM)
# --------------------------------------------------------------------------
def _fused_mlp_kernel(*refs, num_layers: int):
    """refs = (x_ref, w0_ref, b0_ref, w1_ref, b1_ref, ..., o_ref).

    Computes the whole MLP for one batch tile; intermediate activations never
    touch HBM. ReLU on every layer except the last."""
    x_ref = refs[0]
    o_ref = refs[-1]
    wb = refs[1:-1]

    h = x_ref[...]
    for i in range(num_layers):
        w = wb[2 * i][...]
        b = wb[2 * i + 1][...]
        # bf16 (or f32) matmul inputs, f32 MXU accumulation; bias/ReLU on f32.
        acc = jnp.dot(h.astype(w.dtype), w, preferred_element_type=jnp.float32)
        acc = acc + b
        if i < num_layers - 1:
            acc = jnp.maximum(acc, 0.0)
        h = acc
    o_ref[...] = h.astype(o_ref.dtype)
    # TODO(synk): for very large tile_b / hidden dims, ping-pong two explicit
    # VMEM scratch buffers for `h` to bound live VMEM between layers.


# --------------------------------------------------------------------------
# Fallback: per-layer tiled matmul (weights too big to keep resident)
# --------------------------------------------------------------------------
def _linear_layer_kernel(x_ref, w_ref, b_ref, o_ref, acc_ref, *, relu: bool):
    @pl.when(pl.program_id(2) == 0)
    def _():
        acc_ref[...] = jnp.zeros_like(acc_ref)

    acc_ref[...] += jnp.dot(x_ref[...], w_ref[...],
                            preferred_element_type=jnp.float32)

    @pl.when(pl.program_id(2) == pl.num_programs(2) - 1)
    def _():
        out = acc_ref[...] + b_ref[...]
        if relu:
            out = jnp.maximum(out, 0.0)
        o_ref[...] = out.astype(o_ref.dtype)


def _pick_tile(dim: int, pref: int) -> int:
    for t in (pref, 512, 256, 128, SUBLANE):
        if t <= dim and dim % t == 0:
            return t
    return dim


def _dnn_forward_layerwise(x, padded_params, meta, *, out_dtype):
    """One tiled matmul pallas_call per layer (activations round-trip through
    HBM between layers). Used only when all-resident weights exceed VMEM."""
    batch, din = x.shape
    din_p = meta["din_p"]
    cdt = meta["compute_dtype"]
    batch_p = _round_up(batch, SUBLANE)
    h = jnp.zeros((batch_p, din_p), cdt).at[:batch, :din].set(x.astype(cdt))

    n = len(padded_params)
    for li, (w_p, b_p) in enumerate(padded_params):
        relu = li < n - 1
        K, N = w_p.shape
        tm = _pick_tile(batch_p, 512)
        tn = _pick_tile(N, 512)
        tk = _pick_tile(K, 512)
        grid = (batch_p // tm, N // tn, K // tk)
        layer_out_dtype = cdt if relu else out_dtype
        h = pl.pallas_call(
            functools.partial(_linear_layer_kernel, relu=relu),
            out_shape=jax.ShapeDtypeStruct((batch_p, N), layer_out_dtype),
            grid_spec=pltpu.PrefetchScalarGridSpec(
                num_scalar_prefetch=0,
                grid=grid,
                in_specs=[pl.BlockSpec((tm, tk), lambda i, j, k: (i, k)),
                          pl.BlockSpec((tk, tn), lambda i, j, k: (k, j)),
                          pl.BlockSpec((1, tn), lambda i, j, k: (0, j))],
                out_specs=pl.BlockSpec((tm, tn), lambda i, j, k: (i, j)),
                scratch_shapes=[pltpu.VMEM((tm, tn), jnp.float32)]),
            compiler_params=pltpu.CompilerParams(
                dimension_semantics=("parallel", "parallel", "arbitrary")),
        )(h, w_p, b_p)

    return h[:batch, :meta["num_classes"]].astype(out_dtype)


# --------------------------------------------------------------------------
# Forward
# --------------------------------------------------------------------------
def dnn_forward_pallas(x, padded_params, meta, *, max_tile_b: int = 512):
    """Fused forward pass. `padded_params` must come from prepare_dnn_params."""
    batch, din = x.shape
    num_layers = len(padded_params)
    din_p = meta["din_p"]
    out_p = meta["dout_p"]
    num_classes = meta["num_classes"]
    cdt = meta["compute_dtype"]
    out_dtype = jnp.float32
    ic = jnp.dtype(cdt).itemsize

    param_bytes = sum(int(w.size) * w.dtype.itemsize + int(b.size) * b.dtype.itemsize
                      for (w, b) in padded_params)
    max_feat = max([din_p] + [w.shape[1] for (w, _) in padded_params])

    def _resident_bytes(tb):
        return (param_bytes                      # weights/biases, single-buffered
                + 2 * tb * din_p * ic            # double-buffered input tiles
                + 2 * tb * out_p * 4             # double-buffered output tiles
                + 2 * tb * max_feat * 4)         # inter-layer f32 temporaries

    # VMEM-fit guard (matters on v7x's 64 MiB VMEM): if weights alone don't
    # fit resident, fall back to per-layer tiled matmuls.
    if _resident_bytes(SUBLANE) > _RESIDENT_BUDGET_BYTES:
        return _dnn_forward_layerwise(x, padded_params, meta, out_dtype=out_dtype)

    # ---- batch tiling (shrink tile until the footprint fits) ------------
    tile_b = min(max_tile_b, _round_up(batch, SUBLANE))
    while tile_b > SUBLANE and _resident_bytes(tile_b) > _RESIDENT_BUDGET_BYTES:
        tile_b = _round_up(tile_b // 2, SUBLANE)

    batch_p = _round_up(batch, tile_b)
    grid = (batch_p // tile_b,)

    x_p = jnp.zeros((batch_p, din_p), cdt).at[:batch, :din].set(x.astype(cdt))

    # ---- block specs -----------------------------------------------------
    in_specs = [pl.BlockSpec((tile_b, din_p), lambda i: (i, 0))]
    flat_params = []
    for (w_p, b_p) in padded_params:
        # Grid-invariant weights/biases: single-buffered -> half the VMEM.
        in_specs.append(pl.BlockSpec(w_p.shape, lambda i: (0, 0),
                                     pipeline_mode=pl.Buffered(1)))
        in_specs.append(pl.BlockSpec(b_p.shape, lambda i: (0, 0),
                                     pipeline_mode=pl.Buffered(1)))
        flat_params.extend([w_p, b_p])
    out_spec = pl.BlockSpec((tile_b, out_p), lambda i: (i, 0))

    # ---- cost estimate (advisory) -----------------------------------------
    flops = sum(2 * batch_p * w.shape[0] * w.shape[1] for (w, _) in padded_params)
    bytes_accessed = (x_p.size * x_p.dtype.itemsize + param_bytes
                      + batch_p * out_p * jnp.dtype(out_dtype).itemsize)
    cost = pl.CostEstimate(flops=flops, transcendentals=0,
                           bytes_accessed=bytes_accessed)

    vmem_limit = int(min(max(_resident_bytes(tile_b) * 1.3, 32 << 20), 60 << 20))

    out_padded = pl.pallas_call(
        functools.partial(_fused_mlp_kernel, num_layers=num_layers),
        out_shape=jax.ShapeDtypeStruct((batch_p, out_p), out_dtype),
        grid_spec=pltpu.PrefetchScalarGridSpec(
            num_scalar_prefetch=0,
            grid=grid,
            in_specs=in_specs,
            out_specs=out_spec,
        ),
        compiler_params=pltpu.CompilerParams(
            # TODO(synk): on v7x use pltpu.CORE_PARALLEL here (with >=2 batch
            # tiles per core) for true 2-TensorCore sharding of the batch axis.
            dimension_semantics=("parallel",),
            vmem_limit_bytes=vmem_limit,
        ),
        cost_estimate=cost,
    )(x_p, *flat_params)

    # Slice off the batch / class padding.
    return out_padded[:batch, :num_classes]


def dnn_reference(x, params):
    n = len(params)
    for i, (w, b) in enumerate(params):
        x = x @ w + b
        if i < n - 1:
            x = jnp.maximum(x, 0.0)
    return x


# --------------------------------------------------------------------------
if __name__ == "__main__":
    key = jax.random.PRNGKey(0)
    k_x, k_p = jax.random.split(key)

    batch = 8
    input_features = 32
    num_classes = 8
    hidden_layers = 3
    hidden_nodes = 64

    x = jax.random.normal(k_x, (batch, input_features), jnp.float32)
    params = init_dnn_params(k_p, input_features, num_classes,
                             hidden_layers, hidden_nodes)
    ref = dnn_reference(x, params)

    # ---- f32 path (exact vs. f32 reference) ------------------------------
    padded_f32, meta_f32 = prepare_dnn_params(
        params, input_features=input_features, compute_dtype=jnp.float32)
    fwd_f32 = jax.jit(lambda xx, pp: dnn_forward_pallas(xx, pp, meta_f32))
    out_f32 = jax.block_until_ready(fwd_f32(x, padded_f32))
    assert out_f32.shape == (batch, num_classes)
    assert jnp.allclose(out_f32, ref, atol=1e-5, rtol=1e-5)

    # ---- bf16 weights/activations, f32 accumulation (v6e/v7x MXU path) ---
    padded_bf16, meta_bf16 = prepare_dnn_params(
        params, input_features=input_features, compute_dtype=jnp.bfloat16)
    fwd_bf16 = jax.jit(lambda xx, pp: dnn_forward_pallas(xx, pp, meta_bf16))
    out_bf16 = jax.block_until_ready(fwd_bf16(x, padded_bf16))
    assert out_bf16.shape == (batch, num_classes)
    assert jnp.allclose(out_bf16, ref, atol=5e-2, rtol=5e-2)

    print("KERNEL_OK")
</pallas_src>

<mosaic_0001>
module attributes {stable_mosaic.version = 11 : i64} {
  func.func @_fused_mlp_kernel(%arg0: i32, %arg1: memref<8x128xf32, #tpu.memory_space<vmem>>, %arg2: memref<128x128xf32, #tpu.memory_space<vmem>>, %arg3: memref<1x128xf32, #tpu.memory_space<vmem>>, %arg4: memref<128x128xf32, #tpu.memory_space<vmem>>, %arg5: memref<1x128xf32, #tpu.memory_space<vmem>>, %arg6: memref<128x128xf32, #tpu.memory_space<vmem>>, %arg7: memref<1x128xf32, #tpu.memory_space<vmem>>, %arg8: memref<128x128xf32, #tpu.memory_space<vmem>>, %arg9: memref<1x128xf32, #tpu.memory_space<vmem>>, %arg10: memref<8x128xf32, #tpu.memory_space<vmem>>) attributes {dimension_semantics = [#tpu.dimension_semantics<parallel>], iteration_bounds = array<i64: 1>, scalar_prefetch = 0 : i64, scratch_operands = 0 : i64, tpu.core_type = #tpu.core_type<tc>, window_params = [{transform_indices = @transform_0, window_bounds = array<i64: 8, 128>}, {pipeline_mode = #tpu.pipeline_mode<synchronous>, transform_indices = @transform_1, window_bounds = array<i64: 128, 128>}, {pipeline_mode = #tpu.pipeline_mode<synchronous>, transform_indices = @transform_2, window_bounds = array<i64: 1, 128>}, {pipeline_mode = #tpu.pipeline_mode<synchronous>, transform_indices = @transform_3, window_bounds = array<i64: 128, 128>}, {pipeline_mode = #tpu.pipeline_mode<synchronous>, transform_indices = @transform_4, window_bounds = array<i64: 1, 128>}, {pipeline_mode = #tpu.pipeline_mode<synchronous>, transform_indices = @transform_5, window_bounds = array<i64: 128, 128>}, {pipeline_mode = #tpu.pipeline_mode<synchronous>, transform_indices = @transform_6, window_bounds = array<i64: 1, 128>}, {pipeline_mode = #tpu.pipeline_mode<synchronous>, transform_indices = @transform_7, window_bounds = array<i64: 128, 128>}, {pipeline_mode = #tpu.pipeline_mode<synchronous>, transform_indices = @transform_8, window_bounds = array<i64: 1, 128>}, {transform_indices = @transform_9, window_bounds = array<i64: 8, 128>}]} {
    %c0 = arith.constant 0 : index
    %c0_0 = arith.constant 0 : index
    %0 = vector.load %arg1[%c0, %c0_0] : memref<8x128xf32, #tpu.memory_space<vmem>>, vector<8x128xf32>
    %c0_1 = arith.constant 0 : index
    %c0_2 = arith.constant 0 : index
    %1 = vector.load %arg2[%c0_1, %c0_2] : memref<128x128xf32, #tpu.memory_space<vmem>>, vector<128x128xf32>
    %c0_3 = arith.constant 0 : index
    %c0_4 = arith.constant 0 : index
    %2 = vector.load %arg3[%c0_3, %c0_4] : memref<1x128xf32, #tpu.memory_space<vmem>>, vector<1x128xf32>
    %cst = arith.constant dense<0.000000e+00> : vector<8x128xf32>
    %3 = tpu.matmul %0, %1, %cst {dimension_numbers = #tpu.dot_dimension_numbers<[1], [0], [0], [1], [0, 0, 1, 1], [], []>} : vector<8x128xf32>, vector<128x128xf32>, vector<8x128xf32> -> vector<8x128xf32>
    %4 = vector.broadcast %2 : vector<1x128xf32> to vector<8x128xf32>
    %5 = arith.addf %3, %4 : vector<8x128xf32>
    %cst_5 = arith.constant 0.000000e+00 : f32
    %6 = vector.broadcast %cst_5 : f32 to vector<8x128xf32>
    %7 = arith.maximumf %5, %6 : vector<8x128xf32>
    %c0_6 = arith.constant 0 : index
    %c0_7 = arith.constant 0 : index
    %8 = vector.load %arg4[%c0_6, %c0_7] : memref<128x128xf32, #tpu.memory_space<vmem>>, vector<128x128xf32>
    %c0_8 = arith.constant 0 : index
    %c0_9 = arith.constant 0 : index
    %9 = vector.load %arg5[%c0_8, %c0_9] : memref<1x128xf32, #tpu.memory_space<vmem>>, vector<1x128xf32>
    %cst_10 = arith.constant dense<0.000000e+00> : vector<8x128xf32>
    %10 = tpu.matmul %7, %8, %cst_10 {dimension_numbers = #tpu.dot_dimension_numbers<[1], [0], [0], [1], [0, 0, 1, 1], [], []>} : vector<8x128xf32>, vector<128x128xf32>, vector<8x128xf32> -> vector<8x128xf32>
    %11 = vector.broadcast %9 : vector<1x128xf32> to vector<8x128xf32>
    %12 = arith.addf %10, %11 : vector<8x128xf32>
    %cst_11 = arith.constant 0.000000e+00 : f32
    %13 = vector.broadcast %cst_11 : f32 to vector<8x128xf32>
    %14 = arith.maximumf %12, %13 : vector<8x128xf32>
    %c0_12 = arith.constant 0 : index
    %c0_13 = arith.constant 0 : index
    %15 = vector.load %arg6[%c0_12, %c0_13] : memref<128x128xf32, #tpu.memory_space<vmem>>, vector<128x128xf32>
    %c0_14 = arith.constant 0 : index
    %c0_15 = arith.constant 0 : index
    %16 = vector.load %arg7[%c0_14, %c0_15] : memref<1x128xf32, #tpu.memory_space<vmem>>, vector<1x128xf32>
    %cst_16 = arith.constant dense<0.000000e+00> : vector<8x128xf32>
    %17 = tpu.matmul %14, %15, %cst_16 {dimension_numbers = #tpu.dot_dimension_numbers<[1], [0], [0], [1], [0, 0, 1, 1], [], []>} : vector<8x128xf32>, vector<128x128xf32>, vector<8x128xf32> -> vector<8x128xf32>
    %18 = vector.broadcast %16 : vector<1x128xf32> to vector<8x128xf32>
    %19 = arith.addf %17, %18 : vector<8x128xf32>
    %cst_17 = arith.constant 0.000000e+00 : f32
    %20 = vector.broadcast %cst_17 : f32 to vector<8x128xf32>
    %21 = arith.maximumf %19, %20 : vector<8x128xf32>
    %c0_18 = arith.constant 0 : index
    %c0_19 = arith.constant 0 : index
    %22 = vector.load %arg8[%c0_18, %c0_19] : memref<128x128xf32, #tpu.memory_space<vmem>>, vector<128x128xf32>
    %c0_20 = arith.constant 0 : index
    %c0_21 = arith.constant 0 : index
    %23 = vector.load %arg9[%c0_20, %c0_21] : memref<1x128xf32, #tpu.memory_space<vmem>>, vector<1x128xf32>
    %cst_22 = arith.constant dense<0.000000e+00> : vector<8x128xf32>
    %24 = tpu.matmul %21, %22, %cst_22 {dimension_numbers = #tpu.dot_dimension_numbers<[1], [0], [0], [1], [0, 0, 1, 1], [], []>} : vector<8x128xf32>, vector<128x128xf32>, vector<8x128xf32> -> vector<8x128xf32>
    %25 = vector.broadcast %23 : vector<1x128xf32> to vector<8x128xf32>
    %26 = arith.addf %24, %25 : vector<8x128xf32>
    %c0_23 = arith.constant 0 : index
    %c0_24 = arith.constant 0 : index
    %27 = vector.load %arg10[%c0_23, %c0_24] : memref<8x128xf32, #tpu.memory_space<vmem>>, vector<8x128xf32>
    tpu.vector_store %arg10[%c0_23, %c0_24], %26 {strides = array<i32>} : memref<8x128xf32, #tpu.memory_space<vmem>>, vector<8x128xf32>,
    return
  }
  func.func @transform_0(%arg0: i32) -> (i32, i32) {
    %c0_i32 = arith.constant 0 : i32
    %c0_i32_0 = arith.constant 0 : i32
    return %arg0, %c0_i32 : i32, i32
  }
  func.func @transform_1(%arg0: i32) -> (i32, i32) {
    %c0_i32 = arith.constant 0 : i32
    %c0_i32_0 = arith.constant 0 : i32
    %c0_i32_1 = arith.constant 0 : i32
    return %c0_i32, %c0_i32_0 : i32, i32
  }
  func.func @transform_2(%arg0: i32) -> (i32, i32) {
    %c0_i32 = arith.constant 0 : i32
    %c0_i32_0 = arith.constant 0 : i32
    %c0_i32_1 = arith.constant 0 : i32
    return %c0_i32, %c0_i32_0 : i32, i32
  }
  func.func @transform_3(%arg0: i32) -> (i32, i32) {
    %c0_i32 = arith.constant 0 : i32
    %c0_i32_0 = arith.constant 0 : i32
    %c0_i32_1 = arith.constant 0 : i32
    return %c0_i32, %c0_i32_0 : i32, i32
  }
  func.func @transform_4(%arg0: i32) -> (i32, i32) {
    %c0_i32 = arith.constant 0 : i32
    %c0_i32_0 = arith.constant 0 : i32
    %c0_i32_1 = arith.constant 0 : i32
    return %c0_i32, %c0_i32_0 : i32, i32
  }
  func.func @transform_5(%arg0: i32) -> (i32, i32) {
    %c0_i32 = arith.constant 0 : i32
    %c0_i32_0 = arith.constant 0 : i32
    %c0_i32_1 = arith.constant 0 : i32
    return %c0_i32, %c0_i32_0 : i32, i32
  }
  func.func @transform_6(%arg0: i32) -> (i32, i32) {
    %c0_i32 = arith.constant 0 : i32
    %c0_i32_0 = arith.constant 0 : i32
    %c0_i32_1 = arith.constant 0 : i32
    return %c0_i32, %c0_i32_0 : i32, i32
  }
  func.func @transform_7(%arg0: i32) -> (i32, i32) {
    %c0_i32 = arith.constant 0 : i32
    %c0_i32_0 = arith.constant 0 : i32
    %c0_i32_1 = arith.constant 0 : i32
    return %c0_i32, %c0_i32_0 : i32, i32
  }
  func.func @transform_8(%arg0: i32) -> (i32, i32) {
    %c0_i32 = arith.constant 0 : i32
    %c0_i32_0 = arith.constant 0 : i32
    %c0_i32_1 = arith.constant 0 : i32
    return %c0_i32, %c0_i32_0 : i32, i32
  }
  func.func @transform_9(%arg0: i32) -> (i32, i32) {
    %c0_i32 = arith.constant 0 : i32
    %c0_i32_0 = arith.constant 0 : i32
    return %arg0, %c0_i32 : i32, i32
  }
}

</mosaic_0001>

<bundles_post_ra>
// kernel: _lambda_.1
= control target key start
LH: loop header
LB: loop body
LE: loop exit
PB: predicated region body
PF: predicated region fallthrough
CT: control target
= control target key end

     0   :  { %14 = vsyncpa [#allocation3], 0  ;;  %s1119_s0 = inlined_call_operand.vmem [shape: f32[8,128], index: 0, kind: input, shape index: {}]   ;;  %s1120_s1 = inlined_call_operand.hbm [shape: f32[128,128], index: 1, kind: input, shape index: {}]   ;;  %s1121_s2 = inlined_call_operand.vmem [shape: f32[1,128], index: 2, kind: input, shape index: {}]   ;;  %s1122_s3 = inlined_call_operand.hbm [shape: f32[128,128], index: 3, kind: input, shape index: {}]   ;;  %s1123_s4 = inlined_call_operand.vmem [shape: f32[1,128], index: 4, kind: input, shape index: {}]   ;;  %s1124_s5 = inlined_call_operand.hbm [shape: f32[128,128], index: 5, kind: input, shape index: {}]   ;;  %s1125_s6 = inlined_call_operand.vmem [shape: f32[1,128], index: 6, kind: input, shape index: {}]   ;;  %s1126_s7 = inlined_call_operand.hbm [shape: f32[128,128], index: 7, kind: input, shape index: {}]   ;;  %s1127_s8 = inlined_call_operand.vmem [shape: f32[1,128], index: 8, kind: input, shape index: {}]   ;;  %s1128_s9 = inlined_call_operand.hbm [shape: f32[8,128], index: 9, kind: output, shape index: {}]  }
   0x1   :  { %15 = vsyncpa [#allocation6], 0 }
   0x2   :  { %16 = vsyncpa [#allocation9], 0 }
   0x3   :  { %17 = vsyncpa [#allocation4], 0  ;;  %s918_s30 = smov [#allocation5]   ;;  %s919_s11 = smov [#allocation2]  }
   0x4   :  { %s39_s10 = sshll.u32 %s918_s30, 4  ;;  %s25_s12 = sshll.u32 %s919_s11, 4  ;;  %s40_s10 = int_to_ptr.vmem [resolvable:$true] %s39_s10  ;;  %s978_s12 = int_to_ptr.vmem [resolvable:$true] %s25_s12 }
   0x5   :  { %s800_s15 = scalar_lea.hbm %s1122_s3, 2048 }
   0x6   :  { %p801_p0 = scmp.ne.s32.totalorder %s1122_s3, %s800_s15  ;;  %p804_p1 = scmp.lt.u32.totalorder %s800_s15, %s1122_s3 }
   0x8   :  { %p806_p2 = pnand %p804_p1, %p801_p0 }
   0xa   :  { %809 = shalt.err (!%p806_p2)
}
   0xb   :  { %s810_s20 = scalar_lea.vmem %s40_s10, 2048  ;;  %p815_p4 = scmp.lt.s32.totalorder %s40_s10, %s40_s10 }
   0xc   :  { %p811_p3 = scmp.ne.s32.totalorder %s40_s10, %s810_s20  ;;  %p816_p5 = scmp.lt.s32.totalorder %s810_s20, %s810_s20 }
   0xe   :  { %p817_p6 = por %p816_p5, %p815_p4 }
  0x10   :  { %p818_p7 = pnand %p817_p6, %p811_p3 }
  0x12   :  { %821 = shalt.err (!%p818_p7)
}
  0x13   :  { %s920_s21 = smov 128   ;;  %s921_s22 = smov 8  }
  0x14   :  { %45 = dma.hbm_to_vmem [thread:$0]  %s1122_s3, 2048, %s40_s10, [#allocation6], %s920_s21, %s920_s21, %s921_s22  }
  0x15   :  { %s822_s27 = scalar_lea.hbm %s1120_s1, 2048 }
  0x16   :  { %p823_p8 = scmp.ne.s32.totalorder %s1120_s1, %s822_s27  ;;  %p826_p9 = scmp.lt.u32.totalorder %s822_s27, %s1120_s1 }
  0x18   :  { %p828_p10 = pnand %p826_p9, %p823_p8 }
  0x1a   :  { %831 = shalt.err (!%p828_p10)
}
  0x1b   :  { %s832_s13 = scalar_lea.vmem %s978_s12, 2048  ;;  %p837_p12 = scmp.lt.s32.totalorder %s978_s12, %s978_s12 }
  0x1c   :  { %p833_p11 = scmp.ne.s32.totalorder %s978_s12, %s832_s13  ;;  %p838_p13 = scmp.lt.s32.totalorder %s832_s13, %s832_s13 }
  0x1e   :  { %p839_p0 = por %p838_p13, %p837_p12 }
  0x20   :  { %p840_p1 = pnand %p839_p0, %p833_p11 }
  0x22   :  { %843 = shalt.err (!%p840_p1)
}
  0x23   :  { %31 = dma.hbm_to_vmem [thread:$0]  %s1120_s1, 2048, %s978_s12, [#allocation3], %s920_s21, %s920_s21, %s921_s22  }
  0x24   :  { %s922_s14 = smov [#allocation7]   ;;  %s923_s16 = smov [#allocation8]  }
  0x25   :  { %s53_s15 = sshll.u32 %s922_s14, 4  ;;  %s67_s17 = sshll.u32 %s923_s16, 4  ;;  %s54_s15 = int_to_ptr.vmem [resolvable:$true] %s53_s15  ;;  %s1015_s17 = int_to_ptr.vmem [resolvable:$true] %s67_s17 }
  0x26   :  { %s844_s20 = scalar_lea.hbm %s1124_s5, 2048 }
  0x27   :  { %p845_p2 = scmp.ne.s32.totalorder %s1124_s5, %s844_s20  ;;  %p848_p3 = scmp.lt.u32.totalorder %s844_s20, %s1124_s5 }
  0x29   :  { %p850_p4 = pnand %p848_p3, %p845_p2 }
  0x2b   :  { %853 = shalt.err (!%p850_p4)
}
  0x2c   :  { %s854_s1 = scalar_lea.vmem %s54_s15, 2048  ;;  %p859_p6 = scmp.lt.s32.totalorder %s54_s15, %s54_s15 }
  0x2d   :  { %p855_p5 = scmp.ne.s32.totalorder %s54_s15, %s854_s1  ;;  %p860_p7 = scmp.lt.s32.totalorder %s854_s1, %s854_s1 }
  0x2f   :  { %p861_p8 = por %p860_p7, %p859_p6 }
  0x31   :  { %p862_p9 = pnand %p861_p8, %p855_p5 }
  0x33   :  { %865 = shalt.err (!%p862_p9)
}
  0x34   :  { %59 = dma.hbm_to_vmem [thread:$0]  %s1124_s5, 2048, %s54_s15, [#allocation6], %s920_s21, %s920_s21, %s921_s22  }
  0x35   :  { %s866_s30 = scalar_lea.hbm %s1126_s7, 2048 }
  0x36   :  { %p867_p10 = scmp.ne.s32.totalorder %s1126_s7, %s866_s30  ;;  %p870_p11 = scmp.lt.u32.totalorder %s866_s30, %s1126_s7 }
  0x38   :  { %p872_p12 = pnand %p870_p11, %p867_p10 }
  0x3a   :  { %875 = shalt.err (!%p872_p12)
}
  0x3b   :  { %s876_s14 = scalar_lea.vmem %s1015_s17, 2048  ;;  %p881_p0 = scmp.lt.s32.totalorder %s1015_s17, %s1015_s17 }
  0x3c   :  { %p877_p13 = scmp.ne.s32.totalorder %s1015_s17, %s876_s14  ;;  %p882_p1 = scmp.lt.s32.totalorder %s876_s14, %s876_s14 }
  0x3e   :  { %p883_p2 = por %p882_p1, %p881_p0 }
  0x40   :  { %p884_p3 = pnand %p883_p2, %p877_p13 }
  0x42   :  { %887 = shalt.err (!%p884_p3)
}
  0x43   :  { %73 = dma.hbm_to_vmem [thread:$0]  %s1126_s7, 2048, %s1015_s17, [#allocation9], %s920_s21, %s920_s21, %s921_s22  }
  0x44   :  { %910 = dma.done.wait [#allocation3], 2048  }
  0x45   :  { %911 = vsyncadd [#allocation3], 4294965248 }
  0x46   :  { %912 = dma.done.wait [#allocation6], 4096  }
  0x47   :  { %913 = vsyncadd [#allocation6], 4294963200 }
  0x48   :  { %914 = dma.done.wait [#allocation9], 2048  }
  0x49   :  { %915 = vsyncadd [#allocation9], 4294965248  ;;  %v924_v0 = vmov 0.0|0.0   ;;  %vm925_vm0 = vmmov 0   ;;  %v926_v1 = vmov 0.0   ;;  %v89_v2 = vld [vmem:[#allocation2] sm:$0xff] }
  0x4a   :  { %694 = vmatprep.subr.bf16.mxu0 %v924_v0  ;;  %586 = vmatprep.mubr.msk.f32.mxu0 %vm925_vm0, %v926_v1  ;;  %v90_v3 = vld [vmem:[#allocation2 + $0x8] sm:$0xff]  ;;  %v91_v4 = vld [vmem:[#allocation2 + $0x10] sm:$0xff]  ;;  %v92_v6 = vld [vmem:[#allocation2 + $0x18] sm:$0xff]  ;;  %s927_s20 = smov [#allocation10]  }
  0x4b   :  { %718 = vmatprep.subr.bf16.mxu1 %v924_v0  ;;  %621 = vmatprep.mubr.msk.f32.mxu1 %vm925_vm0, %v926_v1  ;;  %v695_v5 = vpack.c.bf16 %v90_v3, %v89_v2  ;;  %v698_v7 = vpack.c.bf16 %v92_v6, %v91_v4  ;;  %v93_v8 = vld [vmem:[#allocation2 + $0x20] sm:$0xff]  ;;  %v94_v9 = vld [vmem:[#allocation2 + $0x28] sm:$0xff]  ;;  %v185_v12 = vld [vmem:[#allocation5 + $0x10] sm:$0xff]  ;;  %s471_s23 = sshll.u32 %s927_s20, 4  ;;  %s472_s23 = int_to_ptr.vmem [resolvable:$true] %s471_s23 }
  0x4c   :  { %v183_v10 = vld [vmem:[#allocation5] sm:$0xff]  ;;  %v184_v11 = vld [vmem:[#allocation5 + $0x8] sm:$0xff]  ;;  %v186_v13 = vld [vmem:[#allocation5 + $0x18] sm:$0xff]  ;;  %v701_v14 = vpack.c.bf16 %v94_v9, %v93_v8  ;;  %s888_s24 = scalar_lea.vmem %s472_s23, 128  ;;  %p893_p5 = scmp.lt.s32.totalorder %s472_s23, %s472_s23 }
  0x4d   :  { %696 = vmatpush3.bf16.msra.mxu0 %v695_v5  ;;  %v719_v15 = vpack.c.bf16 %v184_v11, %v183_v10  ;;  %v95_v16 = vld [vmem:[#allocation2 + $0x30] sm:$0xff]  ;;  %v96_v17 = vld [vmem:[#allocation2 + $0x38] sm:$0xff]  ;;  %v722_v18 = vpack.c.bf16 %v186_v13, %v185_v12  ;;  %v187_v19 = vld [vmem:[#allocation5 + $0x20] sm:$0xff]  ;;  %p889_p4 = scmp.ne.s32.totalorder %s472_s23, %s888_s24  ;;  %p894_p6 = scmp.lt.s32.totalorder %s888_s24, %s888_s24 }
  0x4e   :  { %697 = vmatprep.subr.bf16.mxu0 %v924_v0  ;;  %v188_v20 = vld [vmem:[#allocation5 + $0x28] sm:$0xff]  ;;  %v704_v21 = vpack.c.bf16 %v96_v17, %v95_v16  ;;  %v97_v22 = vld [vmem:[#allocation2 + $0x40] sm:$0xff]  ;;  %v189_v25 = vld [vmem:[#allocation5 + $0x30] sm:$0xff] }
  0x4f   :  { %720 = vmatpush3.bf16.msra.mxu1 %v719_v15  ;;  %v98_v23 = vld [vmem:[#allocation2 + $0x48] sm:$0xff]  ;;  %v725_v24 = vpack.c.bf16 %v188_v20, %v187_v19  ;;  %v190_v26 = vld [vmem:[#allocation5 + $0x38] sm:$0xff]  ;;  %v99_v28 = vld [vmem:[#allocation2 + $0x50] sm:$0xff]  ;;  %p895_p7 = por %p894_p6, %p893_p5 }
  0x50   :  { %721 = vmatprep.subr.bf16.mxu1 %v924_v0  ;;  %v707_v27 = vpack.c.bf16 %v98_v23, %v97_v22  ;;  %v100_v29 = vld [vmem:[#allocation2 + $0x58] sm:$0xff]  ;;  %v728_v30 = vpack.c.bf16 %v190_v26, %v189_v25  ;;  %v191_v31 = vld [vmem:[#allocation5 + $0x40] sm:$0xff]  ;;  %v192_v32 = vld [vmem:[#allocation5 + $0x48] sm:$0xff] }
  0x51   :  { %699 = vmatpush3.bf16.msra.mxu0 %v698_v7  ;;  %v710_v33 = vpack.c.bf16 %v100_v29, %v99_v28  ;;  %v101_v34 = vld [vmem:[#allocation2 + $0x60] sm:$0xff]  ;;  %v102_v35 = vld [vmem:[#allocation2 + $0x68] sm:$0xff]  ;;  %v731_v36 = vpack.c.bf16 %v192_v32, %v191_v31  ;;  %v193_v37 = vld [vmem:[#allocation5 + $0x50] sm:$0xff]  ;;  %p896_p8 = pnand %p895_p7, %p889_p4 }
  0x52   :  { %700 = vmatprep.subr.bf16.mxu0 %v924_v0  ;;  %v194_v38 = vld [vmem:[#allocation5 + $0x58] sm:$0xff]  ;;  %v713_v39 = vpack.c.bf16 %v102_v35, %v101_v34  ;;  %v103_v40 = vld [vmem:[#allocation2 + $0x70] sm:$0xff]  ;;  %v195_v43 = vld [vmem:[#allocation5 + $0x60] sm:$0xff] }
  0x53   :  { %723 = vmatpush3.bf16.msra.mxu1 %v722_v18  ;;  %v104_v41 = vld [vmem:[#allocation2 + $0x78] sm:$0xff]  ;;  %v734_v42 = vpack.c.bf16 %v194_v38, %v193_v37  ;;  %v196_v44 = vld [vmem:[#allocation5 + $0x68] sm:$0xff]  ;;  %v88_v47 = vld [vmem:[%s1119_s0] sm:$0xff] }
  0x54   :  { %724 = vmatprep.subr.bf16.mxu1 %v924_v0  ;;  %v716_v45 = vpack.c.bf16 %v104_v41, %v103_v40  ;;  %v737_v46 = vpack.c.bf16 %v196_v44, %v195_v43  ;;  %v197_v48 = vld [vmem:[#allocation5 + $0x70] sm:$0xff]  ;;  %v198_v49 = vld [vmem:[#allocation5 + $0x78] sm:$0xff]  ;;  %v277_v51 = vld [vmem:[#allocation7] sm:$0xff] }
  0x55   :  { %702 = vmatpush3.bf16.msra.mxu0 %v701_v14  ;;  %v740_v50 = vpack.c.bf16 %v198_v49, %v197_v48  ;;  %v278_v52 = vld [vmem:[#allocation7 + $0x8] sm:$0xff]  ;;  %v279_v53 = vld [vmem:[#allocation7 + $0x10] sm:$0xff]  ;;  %v280_v55 = vld [vmem:[#allocation7 + $0x18] sm:$0xff] }
  0x56   :  { %703 = vmatprep.subr.bf16.mxu0 %v924_v0  ;;  %v743_v54 = vpack.c.bf16 %v278_v52, %v277_v51  ;;  %v746_v56 = vpack.c.bf16 %v280_v55, %v279_v53  ;;  %v281_v57 = vld [vmem:[#allocation7 + $0x20] sm:$0xff]  ;;  %v282_v58 = vld [vmem:[#allocation7 + $0x28] sm:$0xff]  ;;  %v283_v60 = vld [vmem:[#allocation7 + $0x30] sm:$0xff] }
  0x57   :  { %726 = vmatpush3.bf16.msra.mxu1 %v725_v24  ;;  %v749_v59 = vpack.c.bf16 %v282_v58, %v281_v57  ;;  %v284_v61 = vld [vmem:[#allocation7 + $0x38] sm:$0xff]  ;;  %v285_v63 = vld [vmem:[#allocation7 + $0x40] sm:$0xff]  ;;  %v286_v2 = vld [vmem:[#allocation7 + $0x48] sm:$0xff] }
  0x58   :  { %727 = vmatprep.subr.bf16.mxu1 %v924_v0  ;;  %v752_v62 = vpack.c.bf16 %v284_v61, %v283_v60  ;;  %v755_v3 = vpack.c.bf16 %v286_v2, %v285_v63  ;;  %v287_v4 = vld [vmem:[#allocation7 + $0x50] sm:$0xff]  ;;  %v288_v5 = vld [vmem:[#allocation7 + $0x58] sm:$0xff]  ;;  %v289_v7 = vld [vmem:[#allocation7 + $0x60] sm:$0xff] }
  0x59   :  { %705 = vmatpush3.bf16.msra.mxu0 %v704_v21  ;;  %v758_v6 = vpack.c.bf16 %v288_v5, %v287_v4  ;;  %v290_v8 = vld [vmem:[#allocation7 + $0x68] sm:$0xff]  ;;  %v482_v10 = vld [vmem:[%s1121_s2] ss:$0 sm:$0xff]  ;;  %v291_v15 = vld [vmem:[#allocation7 + $0x70] sm:$0xff] }
  0x5a   :  { %706 = vmatprep.subr.bf16.mxu0 %v924_v0  ;;  %v761_v9 = vpack.c.bf16 %v290_v8, %v289_v7  ;;  %v292_v16 = vld [vmem:[#allocation7 + $0x78] sm:$0xff]  ;;  %v371_v18 = vld [vmem:[#allocation8] sm:$0xff]  ;;  %v372_v19 = vld [vmem:[#allocation8 + $0x8] sm:$0xff] }
  0x5b   :  { %729 = vmatpush3.bf16.msra.mxu1 %v728_v30  ;;  %v764_v17 = vpack.c.bf16 %v292_v16, %v291_v15  ;;  %v373_v20 = vld [vmem:[#allocation8 + $0x10] sm:$0xff]  ;;  %v767_v21 = vpack.c.bf16 %v372_v19, %v371_v18  ;;  %v374_v22 = vld [vmem:[#allocation8 + $0x18] sm:$0xff]  ;;  %v375_v24 = vld [vmem:[#allocation8 + $0x20] sm:$0xff] }
  0x5c   :  { %730 = vmatprep.subr.bf16.mxu1 %v924_v0  ;;  %v770_v23 = vpack.c.bf16 %v374_v22, %v373_v20  ;;  %v376_v25 = vld [vmem:[#allocation8 + $0x28] sm:$0xff]  ;;  %v379_v29 = vld [vmem:[#allocation8 + $0x40] sm:$0xff]  ;;  %v381_v32 = vld [vmem:[#allocation8 + $0x50] sm:$0xff] }
  0x5d   :  { %708 = vmatpush3.bf16.msra.mxu0 %v707_v27  ;;  %v773_v26 = vpack.c.bf16 %v376_v25, %v375_v24  ;;  %v378_v27 = vld [vmem:[#allocation8 + $0x38] sm:$0xff]  ;;  %v380_v30 = vld [vmem:[#allocation8 + $0x48] sm:$0xff]  ;;  %v383_v35 = vld [vmem:[#allocation8 + $0x60] sm:$0xff] }
  0x5e   :  { %709 = vmatprep.subr.bf16.mxu0 %v924_v0  ;;  %v779_v31 = vpack.c.bf16 %v380_v30, %v379_v29  ;;  %v483_v38 = vld [vmem:[%s1123_s4] ss:$0 sm:$0xff]  ;;  %v385_v43 = vld [vmem:[#allocation8 + $0x70] sm:$0xff]  ;;  %v386_v44 = vld [vmem:[#allocation8 + $0x78] sm:$0xff] }
  0x5f   :  { %732 = vmatpush3.bf16.msra.mxu1 %v731_v36  ;;  %v384_v36 = vld [vmem:[#allocation8 + $0x68] sm:$0xff] }
  0x60   :  { %733 = vmatprep.subr.bf16.mxu1 %v924_v0  ;;  %v785_v37 = vpack.c.bf16 %v384_v36, %v383_v35 }
  0x61   :  { %711 = vmatpush3.bf16.msra.mxu0 %v710_v33  ;;  %v382_v33 = vld [vmem:[#allocation8 + $0x58] sm:$0xff] }
  0x62   :  { %712 = vmatprep.subr.bf16.mxu0 %v924_v0  ;;  %v782_v34 = vpack.c.bf16 %v382_v33, %v381_v32 }
  0x63   :  { %735 = vmatpush3.bf16.msra.mxu1 %v734_v42 }
  0x64   :  { %736 = vmatprep.subr.bf16.mxu1 %v924_v0 }
  0x65   :  { %714 = vmatpush3.bf16.msra.mxu0 %v713_v39 }
  0x66   :  { %715 = vmatprep.subr.bf16.mxu0 %v924_v0 }
  0x67   :  { %738 = vmatpush3.bf16.msra.mxu1 %v737_v46  ;;  %v484_v46 = vld [vmem:[%s1125_s6] ss:$0 sm:$0xff] }
  0x68   :  { %739 = vmatprep.subr.bf16.mxu1 %v924_v0 }
  0x69   :  { %717 = vmatpush3.bf16.msra.mxu0 %v716_v45  ;;  %v788_v45 = vpack.c.bf16 %v386_v44, %v385_v43 }
  0x6a   :  { %742 = vmatprep.subr.bf16.mxu0 %v924_v0 }
  0x6b   :  { %741 = vmatpush3.bf16.msra.mxu1 %v740_v50  ;;  %v485_v50 = vld [vmem:[%s1127_s8] ss:$0 sm:$0xff] }
  0x6c   :  { %587 = vmatmul.mubr.f32.vlgmr.msra.gmra.mrb[0].mxu0 %v88_v47  ;;  %766 = vmatprep.subr.bf16.mxu1 %v924_v0 }
  0x6d   :  { %656 = vmatprep.mubr.msk.f32.mxu0 %vm925_vm0, %v926_v1  ;;  %744 = vmatpush3.bf16.msra.mxu0 %v743_v54 }
  0x6e   :  { %745 = vmatprep.subr.bf16.mxu0 %v924_v0 }
  0x71   :  { %747 = vmatpush3.bf16.msra.mxu0 %v746_v56 }
  0x72   :  { %748 = vmatprep.subr.bf16.mxu0 %v924_v0 }
  0x75   :  { %750 = vmatpush3.bf16.msra.mxu0 %v749_v59 }
  0x76   :  { %751 = vmatprep.subr.bf16.mxu0 %v924_v0 }
  0x79   :  { %753 = vmatpush3.bf16.msra.mxu0 %v752_v62 }
  0x7a   :  { %754 = vmatprep.subr.bf16.mxu0 %v924_v0 }
  0x7d   :  { %756 = vmatpush3.bf16.msra.mxu0 %v755_v3 }
  0x7e   :  { %757 = vmatprep.subr.bf16.mxu0 %v924_v0 }
  0x81   :  { %759 = vmatpush3.bf16.msra.mxu0 %v758_v6 }
  0x82   :  { %760 = vmatprep.subr.bf16.mxu0 %v924_v0 }
  0x85   :  { %762 = vmatpush3.bf16.msra.mxu0 %v761_v9 }
  0x86   :  { %763 = vmatprep.subr.bf16.mxu0 %v924_v0 }
  0x89   :  { %765 = vmatpush3.bf16.msra.mxu0 %v764_v17 }
 0x13f   :  { %v178_v11 = vpop.f32.mrb[0].mxu0 }
 0x140   :  { %v179_v12 = vadd.f32 %v482_v10, %v178_v11  ;;  %v588_v13 = vpop.f32.mrb[1].mxu0 }
 0x142   :  { %v182_v14 = vmax.f32 %v179_v12, 0.0 }
 0x144   :  { %622 = vmatmul.mubr.f32.vlgmr.msra.gmra.mrb[0].mxu1 %v182_v14 }
 0x145   :  { %691 = vmatprep.mubr.msk.f32.mxu1 %vm925_vm0, %v926_v1  ;;  %768 = vmatpush3.bf16.msra.mxu1 %v767_v21  ;;  %v377_v1 = vld [vmem:[#allocation8 + $0x30] sm:$0xff] }
 0x146   :  { %769 = vmatprep.subr.bf16.mxu1 %v924_v0  ;;  %v776_v28 = vpack.c.bf16 %v378_v27, %v377_v1 }
 0x149   :  { %771 = vmatpush3.bf16.msra.mxu1 %v770_v23 }
 0x14a   :  { %772 = vmatprep.subr.bf16.mxu1 %v924_v0 }
 0x14d   :  { %774 = vmatpush3.bf16.msra.mxu1 %v773_v26 }
 0x14e   :  { %775 = vmatprep.subr.bf16.mxu1 %v924_v0 }
 0x151   :  { %777 = vmatpush3.bf16.msra.mxu1 %v776_v28 }
 0x152   :  { %778 = vmatprep.subr.bf16.mxu1 %v924_v0 }
 0x155   :  { %780 = vmatpush3.bf16.msra.mxu1 %v779_v31 }
 0x156   :  { %781 = vmatprep.subr.bf16.mxu1 %v924_v0 }
 0x159   :  { %783 = vmatpush3.bf16.msra.mxu1 %v782_v34 }
 0x15a   :  { %784 = vmatprep.subr.bf16.mxu1 %v924_v0 }
 0x15d   :  { %786 = vmatpush3.bf16.msra.mxu1 %v785_v37 }
 0x15e   :  { %787 = vmatprep.subr.bf16.mxu1 %v924_v0 }
 0x161   :  { %789 = vmatpush3.bf16.msra.mxu1 %v788_v45 }
 0x217   :  { %v272_v39 = vpop.f32.mrb[0].mxu1 }
 0x218   :  { %v273_v40 = vadd.f32 %v483_v38, %v272_v39  ;;  %v623_v41 = vpop.f32.mrb[1].mxu1 }
 0x21a   :  { %v276_v42 = vmax.f32 %v273_v40, 0.0 }
 0x21c   :  { %657 = vmatmul.mubr.f32.vlgmr.msra.gmra.mrb[2].mxu0 %v276_v42 }
 0x2ef   :  { %v366_v47 = vpop.f32.mrb[2].mxu0 }
 0x2f0   :  { %v367_v48 = vadd.f32 %v484_v46, %v366_v47  ;;  %v658_v0 = vpop.f32.mrb[3].mxu0 }
 0x2f2   :  { %v370_v49 = vmax.f32 %v367_v48, 0.0 }
 0x2f4   :  { %692 = vmatmul.mubr.f32.vlgmr.msra.gmra.mrb[2].mxu1 %v370_v49 }
 0x3c7   :  { %v460_v51 = vpop.f32.mrb[2].mxu1 }
 0x3c8   :  { %v461_v52 = vadd.f32 %v485_v50, %v460_v51  ;;  %v693_v53 = vpop.f32.mrb[3].mxu1 }
 0x3ca   :  { %464 = vst [vmem:[#allocation10] sm:$0xff] %v461_v52 }
 0x3cb   :  { %899 = shalt.err (!%p896_p8)
}
 0x3cc   :  { %s900_s26 = scalar_lea.hbm %s1128_s9, 128 }
 0x3cd   :  { %p901_p9 = scmp.ne.s32.totalorder %s1128_s9, %s900_s26  ;;  %p904_p10 = scmp.lt.u32.totalorder %s900_s26, %s1128_s9 }
 0x3cf   :  { %p906_p11 = pnand %p904_p10, %p901_p9 }
 0x3d1   :  { %909 = shalt.err (!%p906_p11)
}
 0x3d2   :  { %474 = dma.vmem_to_hbm [thread:$0]  %s472_s23, 128, %s1128_s9, [#allocation4]  }
 0x3d3   :  { %916 = dma.done.wait [#allocation4], 128  }
 0x3d4   :  { %917 = vsyncadd [#allocation4], 4294967168 }
 0x3d5   :  { %478 = vsyncpa [#allocation3], 1 }
 0x3d6   :  { %479 = vsyncpa [#allocation6], 1 }
 0x3d7   :  { %480 = vsyncpa [#allocation9], 1 }
 0x3d8   :  { %481 = vsyncpa [#allocation4], 1 }

</bundles_post_ra>
